<compile_context>
chip_gen: v7x
topology: tpu7x:2x2x1
jax: 0.10.0
libtpu: 0.0.40
codegen_flags: <defaults>
</compile_context>

<pallas_src>
import jax
import jax.numpy as jnp
from jax.experimental import pallas as pl
from jax.experimental.pallas import tpu as pltpu


def _round_up(x, m):
    return (x + m - 1) // m * m


def _vmem_capacity_bytes():
    try:
        info = pltpu.get_tpu_info()
        cap = getattr(info, "vmem_capacity_bytes", None)
        if cap:
            return int(cap)
    except Exception:
        pass
    return 64 * 1024 * 1024  # conservative default: v7x per-TensorCore VMEM


# ---------------------------------------------------------------------------
# Path A: weights fully resident in VMEM (no K grid axis, W DMA'd once).
# ---------------------------------------------------------------------------
def _resident_kernel(x_ref, w_ref, b_ref, o_ref):
    # x_ref: (tm, Hp) f32 (full K extent; also the residual source)
    # w_ref: (Hp, Hp) bf16 (index_map constant => fetched from HBM once)
    # b_ref: (1, Hp)  f32
    # o_ref: (tm, Hp) f32
    x = x_ref[...]
    acc = jnp.dot(x.astype(w_ref.dtype), w_ref[...],
                  preferred_element_type=jnp.float32)
    o_ref[...] = (acc + b_ref[...] + x).astype(o_ref.dtype)


def _resident_kernel_split(x_ref, w_ref, b_ref, x_res_ref, o_ref):
    # N axis split into column slabs (megacore case); residual comes from its
    # own (tm, tn) block.  W column slabs are still each fetched only once.
    acc = jnp.dot(x_ref[...].astype(w_ref.dtype), w_ref[...],
                  preferred_element_type=jnp.float32)
    o_ref[...] = (acc + b_ref[...] + x_res_ref[...]).astype(o_ref.dtype)


# ---------------------------------------------------------------------------
# Path B: K-streaming fallback for very large hidden sizes.
# ---------------------------------------------------------------------------
def _streaming_kernel(x_mm_ref, w_ref, b_ref, x_res_ref, o_ref, acc_ref):
    k = pl.program_id(2)
    partial = jnp.dot(x_mm_ref[...].astype(w_ref.dtype), w_ref[...],
                      preferred_element_type=jnp.float32)

    # Fold the bias into the first K step instead of a separate zero-fill pass.
    @pl.when(k == 0)
    def _():
        acc_ref[...] = partial + b_ref[...]

    @pl.when(k != 0)
    def _():
        acc_ref[...] += partial

    # Epilogue: residual add only once, on the final K step.
    @pl.when(k == pl.num_programs(2) - 1)
    def _():
        o_ref[...] = (acc_ref[...] + x_res_ref[...]).astype(o_ref.dtype)


def net_residual_add(x, w, b, *, mm_dtype=jnp.bfloat16):
    """out = fn(x) + x  where fn(x) = x @ w + b.

    x: (batch, seq, hidden) float32
    w: (hidden, hidden)     float32
    b: (hidden,)            float32
    """
    batch, seq, hidden = x.shape
    M = batch * seq
    H = hidden
    Hp = _round_up(H, 128)
    Mp16 = _round_up(M, 16)          # bf16 packs two rows per sublane

    cap = _vmem_capacity_bytes()
    vmem_limit = max(32 * 1024 * 1024, min(int(cap * 0.75), 96 * 1024 * 1024))
    budget = int(vmem_limit * 0.80)  # headroom for Mosaic internal scratch

    # Weights / bias: padded once in the wrapper (one small pass over Hp^2).
    w_mm = jnp.pad(w, ((0, Hp - H), (0, Hp - H))).astype(mm_dtype)
    b_p = jnp.pad(b.reshape(1, H), ((0, 0), (0, Hp - H)))

    tm_cands = (2048, 1024, 512, 256, 128, 64, 32, 16)
    itemsize_mm = jnp.dtype(mm_dtype).itemsize

    def _usage_a(tm):
        # Double-buffered blocks, bytes (conservative).
        return (2 * tm * Hp * 4                 # x (f32)
                + 2 * Hp * Hp * itemsize_mm     # W (bf16)
                + 2 * Hp * 4                    # bias
                + 2 * tm * Hp * 4)              # out (f32)

    use_resident = _usage_a(16) <= budget

    if use_resident:
        # ------------------------- Path A -------------------------
        tm = next(c for c in tm_cands if _usage_a(c) <= budget)
        if Mp16 <= tm:
            tm = Mp16
            Mp = Mp16
        else:
            Mp = _round_up(M, tm)

        # Megacore: with a single M block, split N so 2 TensorCores get work.
        split_n = (Mp // tm == 1) and (Hp % 256 == 0)
        tn = Hp // 2 if split_n else Hp

        x2p = jnp.pad(x.reshape(M, H), ((0, Mp - M), (0, Hp - H)))
        grid = (Mp // tm, Hp // tn)

        cost = pl.CostEstimate(
            flops=2 * Mp * Hp * Hp,
            transcendentals=0,
            bytes_accessed=(Mp * Hp * 4              # x read once (resident over j)
                            + Hp * Hp * itemsize_mm  # W read once
                            + Hp * 4                 # bias
                            + (Mp * Hp * 4 if split_n else 0)  # extra residual read
                            + Mp * Hp * 4),          # output
        )

        if split_n:
            kernel = _resident_kernel_split
            in_specs = [
                pl.BlockSpec((tm, Hp), lambda i, j: (i, 0)),   # x (full K)
                pl.BlockSpec((Hp, tn), lambda i, j: (0, j)),   # W column slab
                pl.BlockSpec((1, tn), lambda i, j: (0, j)),    # bias
                pl.BlockSpec((tm, tn), lambda i, j: (i, j)),   # residual
            ]
            args = (x2p, w_mm, b_p, x2p)
        else:
            kernel = _resident_kernel
            in_specs = [
                pl.BlockSpec((tm, Hp), lambda i, j: (i, 0)),   # x (full K + residual)
                pl.BlockSpec((Hp, Hp), lambda i, j: (0, 0)),   # W fully resident
                pl.BlockSpec((1, Hp), lambda i, j: (0, 0)),    # bias
            ]
            args = (x2p, w_mm, b_p)

        out2p = pl.pallas_call(
            kernel,
            out_shape=jax.ShapeDtypeStruct((Mp, Hp), x.dtype),
            grid_spec=pltpu.PrefetchScalarGridSpec(
                num_scalar_prefetch=0,
                grid=grid,
                in_specs=in_specs,
                out_specs=pl.BlockSpec((tm, tn), lambda i, j: (i, j)),
            ),
            compiler_params=pltpu.CompilerParams(
                dimension_semantics=("parallel", "parallel"),
                vmem_limit_bytes=vmem_limit,
            ),
            cost_estimate=cost,
        )(*args)

    else:
        # ------------------------- Path B -------------------------
        def _largest_div(dim, cands):
            for c in cands:
                if dim % c == 0:
                    return c
            return dim

        tk = _largest_div(Hp, (512, 256, 128))

        def _usage_b(tm, tn):
            return (2 * tm * tk * 4                 # x matmul stream (f32)
                    + 2 * tk * tn * itemsize_mm     # W (bf16)
                    + 2 * tn * 4                    # bias
                    + 2 * tm * tn * 4               # residual
                    + 2 * tm * tn * 4               # out
                    + tm * tn * 4)                  # accumulator

        tn_cands = [c for c in (1024, 512, 256, 128) if Hp % c == 0]
        tm, tn = 16, 128
        done = False
        for cand_tn in tn_cands:
            for cand_tm in tm_cands:
                if _usage_b(cand_tm, cand_tn) <= budget:
                    tm, tn = cand_tm, cand_tn
                    done = True
                    break
            if done:
                break

        if Mp16 <= tm:
            tm = Mp16
            Mp = Mp16
        else:
            Mp = _round_up(M, tm)

        x2p = jnp.pad(x.reshape(M, H), ((0, Mp - M), (0, Hp - H)))
        grid = (Mp // tm, Hp // tn, Hp // tk)

        cost = pl.CostEstimate(
            flops=2 * Mp * Hp * Hp,
            transcendentals=0,
            bytes_accessed=((Hp // tn) * Mp * Hp * 4             # x, re-read per j
                            + (Mp // tm) * Hp * Hp * itemsize_mm  # W, re-read per i
                            + Mp * Hp * 4                         # residual
                            + (Mp // tm) * Hp * 4                 # bias
                            + Mp * Hp * 4),                       # output
        )

        out2p = pl.pallas_call(
            _streaming_kernel,
            out_shape=jax.ShapeDtypeStruct((Mp, Hp), x.dtype),
            grid_spec=pltpu.PrefetchScalarGridSpec(
                num_scalar_prefetch=0,
                grid=grid,
                in_specs=[
                    pl.BlockSpec((tm, tk), lambda i, j, k: (i, k)),   # x (matmul)
                    pl.BlockSpec((tk, tn), lambda i, j, k: (k, j)),   # W
                    pl.BlockSpec((1, tn), lambda i, j, k: (0, j)),    # bias
                    pl.BlockSpec((tm, tn), lambda i, j, k: (i, j)),   # residual
                ],
                out_specs=pl.BlockSpec((tm, tn), lambda i, j, k: (i, j)),
                scratch_shapes=[pltpu.VMEM((tm, tn), jnp.float32)],
            ),
            compiler_params=pltpu.CompilerParams(
                dimension_semantics=("parallel", "parallel", "arbitrary"),
                vmem_limit_bytes=vmem_limit,
            ),
            cost_estimate=cost,
        )(x2p, w_mm, b_p, x2p)

    # Strip padding and restore (batch, seq, hidden).
    return out2p[:M, :H].reshape(batch, seq, hidden)


if __name__ == "__main__":
    key = jax.random.PRNGKey(0)
    k_x, k_w, k_b = jax.random.split(key, 3)

    batch, seq, hidden = 2, 8, 32
    x = jax.random.normal(k_x, (batch, seq, hidden), dtype=jnp.float32)
    w = jax.random.normal(k_w, (hidden, hidden), dtype=jnp.float32) * 0.05
    b = jax.random.normal(k_b, (hidden,), dtype=jnp.float32) * 0.05

    out = net_residual_add(x, w, b)
    out = jax.block_until_ready(out)

    # Reference in plain JAX with the same bf16 matmul operands / f32 accumulate.
    x2 = x.reshape(-1, hidden)
    ref2 = (
        jnp.dot(
            x2.astype(jnp.bfloat16),
            w.astype(jnp.bfloat16),
            preferred_element_type=jnp.float32,
        )
        + b
        + x2
    )
    ref = ref2.reshape(batch, seq, hidden)
    assert jnp.allclose(out, ref, atol=1e-3, rtol=1e-3), "mismatch vs reference"

    # Loose sanity check against the full-f32 reference as well.
    ref_f32 = (x2 @ w + b + x2).reshape(batch, seq, hidden)
    assert jnp.allclose(out, ref_f32, atol=5e-2, rtol=5e-2), "bf16 drift too large"

    print("KERNEL_OK")
</pallas_src>

<mosaic_0001>
module attributes {stable_mosaic.version = 11 : i64} {
  func.func @_resident_kernel(%arg0: i32, %arg1: i32, %arg2: memref<16x128xf32, #tpu.memory_space<vmem>>, %arg3: memref<128x128xbf16, #tpu.memory_space<vmem>>, %arg4: memref<1x128xf32, #tpu.memory_space<vmem>>, %arg5: memref<16x128xf32, #tpu.memory_space<vmem>>) attributes {dimension_semantics = [#tpu.dimension_semantics<parallel>, #tpu.dimension_semantics<parallel>], iteration_bounds = array<i64: 1, 1>, scalar_prefetch = 0 : i64, scratch_operands = 0 : i64, tpu.core_type = #tpu.core_type<tc>, window_params = [{transform_indices = @transform_0, window_bounds = array<i64: 16, 128>}, {pipeline_mode = #tpu.pipeline_mode<synchronous>, transform_indices = @transform_1, window_bounds = array<i64: 128, 128>}, {pipeline_mode = #tpu.pipeline_mode<synchronous>, transform_indices = @transform_2, window_bounds = array<i64: 1, 128>}, {transform_indices = @transform_3, window_bounds = array<i64: 16, 128>}]} {
    %c0 = arith.constant 0 : index
    %c0_0 = arith.constant 0 : index
    %0 = vector.load %arg2[%c0, %c0_0] : memref<16x128xf32, #tpu.memory_space<vmem>>, vector<16x128xf32>
    %1 = arith.truncf %0 : vector<16x128xf32> to vector<16x128xbf16>
    %c0_1 = arith.constant 0 : index
    %c0_2 = arith.constant 0 : index
    %2 = vector.load %arg3[%c0_1, %c0_2] : memref<128x128xbf16, #tpu.memory_space<vmem>>, vector<128x128xbf16>
    %cst = arith.constant dense<0.000000e+00> : vector<16x128xf32>
    %3 = tpu.matmul %1, %2, %cst {dimension_numbers = #tpu.dot_dimension_numbers<[1], [0], [0], [1], [0, 0, 1, 1], [], []>} : vector<16x128xbf16>, vector<128x128xbf16>, vector<16x128xf32> -> vector<16x128xf32>
    %c0_3 = arith.constant 0 : index
    %c0_4 = arith.constant 0 : index
    %4 = vector.load %arg4[%c0_3, %c0_4] : memref<1x128xf32, #tpu.memory_space<vmem>>, vector<1x128xf32>
    %5 = vector.broadcast %4 : vector<1x128xf32> to vector<16x128xf32>
    %6 = arith.addf %3, %5 : vector<16x128xf32>
    %7 = arith.addf %6, %0 : vector<16x128xf32>
    %c0_5 = arith.constant 0 : index
    %c0_6 = arith.constant 0 : index
    %8 = vector.load %arg5[%c0_5, %c0_6] : memref<16x128xf32, #tpu.memory_space<vmem>>, vector<16x128xf32>
    tpu.vector_store %arg5[%c0_5, %c0_6], %7 {strides = array<i32>} : memref<16x128xf32, #tpu.memory_space<vmem>>, vector<16x128xf32>,
    return
  }
  func.func @transform_0(%arg0: i32, %arg1: i32) -> (i32, i32) {
    %c0_i32 = arith.constant 0 : i32
    %c0_i32_0 = arith.constant 0 : i32
    return %arg0, %c0_i32 : i32, i32
  }
  func.func @transform_1(%arg0: i32, %arg1: i32) -> (i32, i32) {
    %c0_i32 = arith.constant 0 : i32
    %c0_i32_0 = arith.constant 0 : i32
    %c0_i32_1 = arith.constant 0 : i32
    return %c0_i32, %c0_i32_0 : i32, i32
  }
  func.func @transform_2(%arg0: i32, %arg1: i32) -> (i32, i32) {
    %c0_i32 = arith.constant 0 : i32
    %c0_i32_0 = arith.constant 0 : i32
    %c0_i32_1 = arith.constant 0 : i32
    return %c0_i32, %c0_i32_0 : i32, i32
  }
  func.func @transform_3(%arg0: i32, %arg1: i32) -> (i32, i32) {
    %c0_i32 = arith.constant 0 : i32
    return %arg0, %arg1 : i32, i32
  }
}

</mosaic_0001>

<bundles_post_ra>
// kernel: tpu_custom_call.1
= control target key start
LH: loop header
LB: loop body
LE: loop exit
PB: predicated region body
PF: predicated region fallthrough
CT: control target
= control target key end

     0   :  { %8 = vsyncpa [#allocation3], 0  ;;  %s382_s0 = inlined_call_operand.hbm [shape: f32[16,128], index: 0, kind: input, shape index: {}]   ;;  %s383_s1 = inlined_call_operand.hbm [shape: bf16[128,128], index: 1, kind: input, shape index: {}]   ;;  %s384_s2 = inlined_call_operand.vmem [shape: f32[1,128], index: 2, kind: input, shape index: {}]   ;;  %s385_s3 = inlined_call_operand.hbm [shape: f32[16,128], index: 3, kind: output, shape index: {}]  }
   0x1   :  { %9 = vsyncpa [#allocation6], 0 }
   0x2   :  { %10 = vsyncpa [#allocation4], 0  ;;  %s308_s12 = smov [#allocation2]   ;;  %s236_s16 = scalar_lea.hbm %s382_s0, 256 }
   0x3   :  { %s16_s13 = sshll.u32 %s308_s12, 4  ;;  %p237_p0 = scmp.ne.s32.totalorder %s382_s0, %s236_s16  ;;  %s17_s13 = int_to_ptr.vmem [resolvable:$true] %s16_s13 }
   0x4   :  { %p240_p1 = scmp.lt.u32.totalorder %s236_s16, %s382_s0 }
   0x6   :  { %p242_p2 = pnand %p240_p1, %p237_p0 }
   0x8   :  { %245 = shalt.err (!%p242_p2)
}
   0x9   :  { %s246_s21 = scalar_lea.vmem %s17_s13, 256  ;;  %p251_p4 = scmp.lt.s32.totalorder %s17_s13, %s17_s13 }
   0xa   :  { %p247_p3 = scmp.ne.s32.totalorder %s17_s13, %s246_s21  ;;  %p252_p5 = scmp.lt.s32.totalorder %s246_s21, %s246_s21 }
   0xc   :  { %p253_p6 = por %p252_p5, %p251_p4 }
   0xe   :  { %p254_p7 = pnand %p253_p6, %p247_p3 }
  0x10   :  { %257 = shalt.err (!%p254_p7)
}
  0x11   :  { %s309_s22 = smov 128   ;;  %s310_s23 = smov 8  }
  0x12   :  { %22 = dma.hbm_to_vmem [thread:$0]  %s382_s0, 256, %s17_s13, [#allocation3], %s309_s22, %s309_s22, %s310_s23  }
  0x13   :  { %s311_s26 = smov [#allocation5]   ;;  %s258_s30 = scalar_lea.hbm %s383_s1, 1024 }
  0x14   :  { %s28_s27 = sshll.u32 %s311_s26, 4  ;;  %p259_p8 = scmp.ne.s32.totalorder %s383_s1, %s258_s30  ;;  %s29_s27 = int_to_ptr.vmem [resolvable:$true] %s28_s27 }
  0x15   :  { %p262_p9 = scmp.lt.u32.totalorder %s258_s30, %s383_s1 }
  0x17   :  { %p264_p10 = pnand %p262_p9, %p259_p8 }
  0x19   :  { %267 = shalt.err (!%p264_p10)
}
  0x1a   :  { %s268_s8 = scalar_lea.vmem %s29_s27, 1024  ;;  %p273_p12 = scmp.lt.s32.totalorder %s29_s27, %s29_s27 }
  0x1b   :  { %p269_p11 = scmp.ne.s32.totalorder %s29_s27, %s268_s8  ;;  %p274_p13 = scmp.lt.s32.totalorder %s268_s8, %s268_s8 }
  0x1d   :  { %p275_p0 = por %p274_p13, %p273_p12 }
  0x1f   :  { %p276_p1 = pnand %p275_p0, %p269_p11 }
  0x21   :  { %279 = shalt.err (!%p276_p1)
}
  0x22   :  { %s312_s0 = smov 64   ;;  %s313_s9 = smov 4  }
  0x23   :  { %34 = dma.hbm_to_vmem [thread:$0]  %s383_s1, 1024, %s29_s27, [#allocation6], %s312_s0, %s312_s0, %s313_s9  }
  0x24   :  { %302 = dma.done.wait [#allocation3], 256  }
  0x25   :  { %303 = vsyncadd [#allocation3], 4294967040 }
  0x26   :  { %304 = dma.done.wait [#allocation6], 1024  }
  0x27   :  { %305 = vsyncadd [#allocation6], 4294966272  ;;  %v314_v0 = vmov 0.0   ;;  %vm315_vm0 = vmmov 0   ;;  %v228_v1 = vld [vmem:[#allocation5] sm:$0xff]   ;;  %v229_v2 = vld [vmem:[#allocation5 + $0x8] sm:$0xff]  }
  0x28   :  { %199 = vmatprep.subr.bf16.mxu0 %v314_v0  ;;  %215 = vmatprep.mubr.msk.bf16.mxu0 %vm315_vm0, %v314_v0  ;;  %v230_v3 = vld [vmem:[#allocation5 + $0x10] sm:$0xff]   ;;  %v231_v4 = vld [vmem:[#allocation5 + $0x18] sm:$0xff]   ;;  %v232_v5 = vld [vmem:[#allocation5 + $0x20] sm:$0xff]   ;;  %s316_s13 = smov [#allocation7]  }
  0x29   :  { %200 = vmatpush3.bf16.msra.mxu0 %v228_v1  ;;  %v233_v6 = vld [vmem:[#allocation5 + $0x28] sm:$0xff]   ;;  %v234_v7 = vld [vmem:[#allocation5 + $0x30] sm:$0xff]   ;;  %v235_v8 = vld [vmem:[#allocation5 + $0x38] sm:$0xff]   ;;  %s168_s14 = sshll.u32 %s316_s13, 4  ;;  %s169_s14 = int_to_ptr.vmem [resolvable:$true] %s168_s14 }
  0x2a   :  { %201 = vmatprep.subr.bf16.mxu0 %v314_v0  ;;  %v44_v9 = vld [vmem:[#allocation2] sm:$0xff]  ;;  %v45_v10 = vld [vmem:[#allocation2 + $0x8] sm:$0xff]  ;;  %s280_s15 = scalar_lea.vmem %s169_s14, 256  ;;  %p285_p3 = scmp.lt.s32.totalorder %s169_s14, %s169_s14 }
  0x2b   :  { %v46_v11 = vpack.c.bf16 %v45_v10, %v44_v9  ;;  %v181_v12 = vld [vmem:[%s384_s2] ss:$0 sm:$0xff]  ;;  %p281_p2 = scmp.ne.s32.totalorder %s169_s14, %s280_s15  ;;  %p286_p4 = scmp.lt.s32.totalorder %s280_s15, %s280_s15 }
  0x2d   :  { %202 = vmatpush3.bf16.msra.mxu0 %v229_v2  ;;  %p287_p5 = por %p286_p4, %p285_p3 }
  0x2e   :  { %203 = vmatprep.subr.bf16.mxu0 %v314_v0 }
  0x2f   :  { %p288_p6 = pnand %p287_p5, %p281_p2 }
  0x31   :  { %204 = vmatpush3.bf16.msra.mxu0 %v230_v3 }
  0x32   :  { %205 = vmatprep.subr.bf16.mxu0 %v314_v0 }
  0x35   :  { %206 = vmatpush3.bf16.msra.mxu0 %v231_v4 }
  0x36   :  { %207 = vmatprep.subr.bf16.mxu0 %v314_v0 }
  0x39   :  { %208 = vmatpush3.bf16.msra.mxu0 %v232_v5 }
  0x3a   :  { %209 = vmatprep.subr.bf16.mxu0 %v314_v0 }
  0x3d   :  { %210 = vmatpush3.bf16.msra.mxu0 %v233_v6 }
  0x3e   :  { %211 = vmatprep.subr.bf16.mxu0 %v314_v0 }
  0x41   :  { %212 = vmatpush3.bf16.msra.mxu0 %v234_v7 }
  0x42   :  { %213 = vmatprep.subr.bf16.mxu0 %v314_v0 }
  0x45   :  { %214 = vmatpush3.bf16.msra.mxu0 %v235_v8 }
  0x48   :  { %216 = vmatmul.mubr.bf16.vlgmr.msra.gmra.mrb[0].mxu0 %v46_v11 }
 0x11b   :  { %v152_v13 = vpop.f32.mrb[0].mxu0 }
 0x11c   :  { %v153_v14 = vadd.f32 %v181_v12, %v152_v13  ;;  %v217_v15 = vpop.f32.mrb[1].mxu0 }
 0x11d   :  { %v155_v16 = vpop.f32.mrb[2].mxu0 }
 0x11e   :  { %v159_v17 = vadd.f32 %v153_v14, %v44_v9  ;;  %v156_v18 = vadd.f32 %v181_v12, %v155_v16  ;;  %v218_v19 = vpop.f32.mrb[3].mxu0 }
 0x120   :  { %161 = vst [vmem:[#allocation7] sm:$0xff] %v159_v17  ;;  %v160_v20 = vadd.f32 %v156_v18, %v45_v10 }
 0x122   :  { %162 = vst [vmem:[#allocation7 + $0x8] sm:$0xff] %v160_v20 }
 0x123   :  { %291 = shalt.err (!%p288_p6)
}
 0x124   :  { %s292_s17 = scalar_lea.hbm %s385_s3, 256 }
 0x125   :  { %p293_p7 = scmp.ne.s32.totalorder %s385_s3, %s292_s17  ;;  %p296_p8 = scmp.lt.u32.totalorder %s292_s17, %s385_s3 }
 0x127   :  { %p298_p9 = pnand %p296_p8, %p293_p7 }
 0x129   :  { %301 = shalt.err (!%p298_p9)
}
 0x12a   :  { %174 = dma.vmem_to_hbm [thread:$0]  %s169_s14, 256, %s385_s3, [#allocation4], %s309_s22, %s309_s22, %s310_s23  }
 0x12b   :  { %306 = dma.done.wait [#allocation4], 256  }
 0x12c   :  { %307 = vsyncadd [#allocation4], 4294967040 }
 0x12d   :  { %178 = vsyncpa [#allocation3], 1 }
 0x12e   :  { %179 = vsyncpa [#allocation6], 1 }
 0x12f   :  { %180 = vsyncpa [#allocation4], 1 }

</bundles_post_ra>
